<compile_context>
chip_gen: v7x
topology: tpu7x:2x2x1
jax: 0.10.0
libtpu: 0.0.40
codegen_flags: <defaults>
</compile_context>

<pallas_src>
import numpy as np

import jax
import jax.numpy as jnp
from jax.experimental import pallas as pl
from jax.experimental.pallas import tpu as pltpu


# --------------------------------------------------------------------------------------
# Kernel
# --------------------------------------------------------------------------------------
def _cnn_fused_kernel(x_ref, w_ref, lmask_ref, b_ref, o_ref):
    """Fused conv-over-time (all K branches) + max-pool + bias for one batch tile.

    x_ref:     (TB, T, D)          unpadded input tile (original dtype, e.g. f32)
    w_ref:     (K_max, D, C_pad)   packed per-branch filters, compute dtype (bf16/f32)
    lmask_ref: (1, C_pad)          f32 additive validity mask for the LAST time row only
    b_ref:     (1, C_pad)          f32 packed biases
    o_ref:     (TB, C_pad)         f32 max-pooled output slab
    """
    TB, T, D = x_ref.shape
    K_max, _, C_pad = w_ref.shape
    p_max = (K_max - 1) // 2
    right_pad = K_max - 1 - p_max
    cdt = w_ref.dtype

    # Cast + halo zero-pad in VMEM (no wrapper-side HBM pad/cast pass).
    x = x_ref[...].astype(cdt)                                     # (TB, T, D)
    parts = []
    if p_max:
        parts.append(jnp.zeros((TB, p_max, D), cdt))
    parts.append(x)
    if right_pad:
        parts.append(jnp.zeros((TB, right_pad, D), cdt))
    xp = jnp.concatenate(parts, axis=1) if len(parts) > 1 else x   # (TB, T+K_max-1, D)

    # K_max accumulated 2-D MXU matmuls with M = TB*T (no 3-D einsum, no im2col buffer).
    acc = None
    for j in range(K_max):                                         # static -> unrolled
        lhs = xp[:, j:j + T, :].reshape(TB * T, D)                 # shifted window rows
        part = jnp.dot(lhs, w_ref[j], preferred_element_type=jnp.float32)
        acc = part if acc is None else acc + part                  # (TB*T, C_pad) f32

    conv = acc.reshape(TB, T, C_pad)
    if T > 1:
        m = jnp.max(conv[:, :T - 1, :], axis=1)                    # rows 0..T-2 valid
        last = conv[:, T - 1, :] + lmask_ref[...]                  # mask even-K last row
        m = jnp.maximum(m, last)
    else:
        m = conv[:, 0, :] + lmask_ref[...]
    # Bias added after the max (time-invariant -> max(a + b) == max(a) + b).
    o_ref[...] = m + b_ref[...]                                    # (TB, C_pad) f32


# --------------------------------------------------------------------------------------
# Parameter packing (one-time, init-time)
# --------------------------------------------------------------------------------------
def pack_cnn_encoding_params(weights, biases, Ks, *, compute_dtype=jnp.bfloat16):
    """Pack torch-layout Conv2d params into fused lane-dense tensors.

    weights[i]: (Co, 1, K_i, D) (torch OIHW), biases[i]: (Co,)
    Returns (w_packed (K_max, D, C_pad), b_packed (1, C_pad) f32,
             last_row_mask (1, C_pad) f32, Cos tuple).
    """
    D = int(weights[0].shape[-1])
    K_max = max(Ks)
    p_max = (K_max - 1) // 2
    Cos = tuple(int(w.shape[0]) for w in weights)
    C_total = sum(Cos)
    C_pad = ((C_total + 127) // 128) * 128                         # lane-dense output

    w_np = np.zeros((K_max, D, C_pad), np.float32)
    b_np = np.zeros((1, C_pad), np.float32)
    lmask_np = np.zeros((1, C_pad), np.float32)
    col = 0
    for w, b, K in zip(weights, biases, Ks):
        Co = int(w.shape[0])
        p = (K - 1) // 2
        j0 = p_max - p                                             # window-row offset
        w_kdc = np.transpose(np.asarray(w)[:, 0], (1, 2, 0))       # (K, D, Co)
        w_np[j0:j0 + K, :, col:col + Co] = w_kdc
        b_np[0, col:col + Co] = np.asarray(b)
        if K % 2 == 0:                                             # even K: T_out = T-1
            lmask_np[0, col:col + Co] = -1e30                      # last fused row invalid
        col += Co
    return (jnp.asarray(w_np, dtype=compute_dtype), jnp.asarray(b_np),
            jnp.asarray(lmask_np), Cos)


# --------------------------------------------------------------------------------------
# Wrapper
# --------------------------------------------------------------------------------------
def _choose_batch_tile(B, per_row_bytes, fixed_bytes, budget_bytes):
    """Biggest sublane-aligned batch tile that fits the VMEM budget, keeping the batch
    grid >= 2 steps once B is large enough (v7x megacore) and preferring tiles that
    divide B (skips the wrapper-side batch-pad copy)."""
    if B <= 8:
        return B                                    # single step; block == full array
    tb_mem = max(8, int((budget_bytes - fixed_bytes) // max(per_row_bytes, 1)))
    cap = B // 2 if B >= 16 else B                  # >= 2 grid steps for realistic B
    tb = max(8, min(tb_mem, cap, 1024))
    tb -= tb % 8                                    # sublane-aligned output tile
    for cand in range(tb, 7, -8):                   # prefer an exact divisor of B ...
        if B % cand == 0 and cand * 2 >= tb:        # ... unless it halves the tile
            return cand
    return tb


def cnn_encoding_pallas(x, w_packed, b_packed, lmask, Ks, Cos, *,
                        batch_tile=None, vmem_tile_budget=12 << 20):
    """x: (B, T, D) f32; w_packed/b_packed/lmask/Cos from pack_cnn_encoding_params."""
    B, T, D = x.shape
    K_max = max(Ks)
    assert w_packed.shape[:2] == (K_max, D), w_packed.shape
    C_pad = int(w_packed.shape[-1])
    C_total = int(sum(Cos))
    it = int(jnp.dtype(w_packed.dtype).itemsize)
    T_pad = T + K_max - 1

    # Per-batch-row VMEM footprint: double-buffered f32 x block, in-kernel padded/cast
    # copy, one live shifted LHS, f32 accumulator (+ max temporaries), double-buffered
    # f32 output block.  Fixed: double-buffered weights/mask/bias (grid-invariant).
    per_row = (2 * T * D * 4) + (T_pad * D * it) + (T * D * it) \
              + (2 * T * C_pad * 4) + (2 * C_pad * 4)
    fixed = 2 * (K_max * D * C_pad * it + 2 * C_pad * 4)
    TB = batch_tile if batch_tile is not None else \
        _choose_batch_tile(B, per_row, fixed, vmem_tile_budget)

    B_grid = (B + TB - 1) // TB
    B_pad = B_grid * TB
    x_in = x if B_pad == B else jnp.pad(x, ((0, B_pad - B), (0, 0), (0, 0)))

    # Explicit VMEM limit (budget sized so it is safe on v7x's 64 MiB as well).
    vmem_limit = int(min(max(2 * (fixed + TB * per_row), 16 << 20), 48 << 20))

    flops = 2 * B_pad * T * K_max * D * C_pad
    bytes_accessed = (x_in.size * x_in.dtype.itemsize + w_packed.size * it
                      + lmask.size * 4 + b_packed.size * 4 + B_pad * C_pad * 4)

    out = pl.pallas_call(
        _cnn_fused_kernel,
        out_shape=jax.ShapeDtypeStruct((B_pad, C_pad), jnp.float32),
        grid_spec=pltpu.PrefetchScalarGridSpec(
            num_scalar_prefetch=0,
            grid=(B_grid,),
            in_specs=[
                pl.BlockSpec((TB, T, D), lambda i: (i, 0, 0)),           # x batch tile
                pl.BlockSpec((K_max, D, C_pad), lambda i: (0, 0, 0)),    # packed filters
                pl.BlockSpec((1, C_pad), lambda i: (0, 0)),              # last-row mask
                pl.BlockSpec((1, C_pad), lambda i: (0, 0)),              # packed bias
            ],
            out_specs=pl.BlockSpec((TB, C_pad), lambda i: (i, 0)),
        ),
        compiler_params=pltpu.CompilerParams(
            dimension_semantics=("parallel",),        # megacore sharding on v7x
            vmem_limit_bytes=vmem_limit,
        ),
        cost_estimate=pl.CostEstimate(flops=int(flops), transcendentals=0,
                                      bytes_accessed=int(bytes_accessed)),
    )(x_in, w_packed, lmask, b_packed)

    return out[:B, :C_total]                                             # (B, sum(Co))


# --------------------------------------------------------------------------------------
# Independent reference (mirrors torch Conv2d NCHW + max-pool + concat)
# --------------------------------------------------------------------------------------
def cnn_encoding_reference(x, weights, biases, Ks):
    outs = []
    lhs = x[:, None, :, :]                                               # (B, 1, T, D)
    for w, b, K in zip(weights, biases, Ks):
        pad = (K - 1) // 2
        conv = jax.lax.conv_general_dilated(
            lhs, w, window_strides=(1, 1),
            padding=((pad, pad), (0, 0)),
            dimension_numbers=("NCHW", "OIHW", "NCHW"),
        )                                                                # (B, Co, T_out, 1)
        conv = conv[..., 0] + b[None, :, None]                           # (B, Co, T_out)
        outs.append(jnp.max(conv, axis=-1))                              # (B, Co)
    return jnp.concatenate(outs, axis=1)


if __name__ == "__main__":
    Ks = [3, 4, 5]

    def make_case(key, B, T, D, Co):
        kx, *kws = jax.random.split(key, 1 + 2 * len(Ks))
        x = jax.random.normal(kx, (B, T, D), dtype=jnp.float32)
        weights, biases = [], []
        for i, K in enumerate(Ks):
            # torch Conv2d weight layout: (out_channels, in_channels=1, K, D)
            w = jax.random.normal(kws[2 * i], (Co, 1, K, D), dtype=jnp.float32) * 0.05
            b = jax.random.normal(kws[2 * i + 1], (Co,), dtype=jnp.float32) * 0.05
            weights.append(w)
            biases.append(b)
        return x, weights, biases

    key = jax.random.PRNGKey(0)
    k1, k2 = jax.random.split(key)

    # Small shapes consistent with the module: hidden_dim = D = Co = 32.
    B, T, D, Co = 2, 8, 32, 32
    x, weights, biases = make_case(k1, B, T, D, Co)
    ref = cnn_encoding_reference(x, weights, biases, Ks)

    # f32 MXU path: tight tolerance vs the conv reference.
    w32, b32, m32, cos = pack_cnn_encoding_params(weights, biases, Ks,
                                                  compute_dtype=jnp.float32)
    out32 = jax.block_until_ready(cnn_encoding_pallas(x, w32, b32, m32, Ks, cos))
    assert out32.shape == (B, Co * len(Ks)), out32.shape
    assert jnp.allclose(out32, ref, atol=1e-4, rtol=1e-4), \
        float(jnp.max(jnp.abs(out32 - ref)))

    # bf16 MXU inputs (v6e/v7x recommended path) with f32 accumulation: looser tolerance.
    wbf, bbf, mbf, cosbf = pack_cnn_encoding_params(weights, biases, Ks,
                                                    compute_dtype=jnp.bfloat16)
    outbf = jax.block_until_ready(cnn_encoding_pallas(x, wbf, bbf, mbf, Ks, cosbf))
    assert outbf.shape == (B, Co * len(Ks)), outbf.shape
    assert jnp.allclose(outbf, ref, atol=5e-2, rtol=5e-2), \
        float(jnp.max(jnp.abs(outbf - ref)))

    # Larger batch: exercises the multi-step grid (>= 2 steps for megacore), the
    # sublane-aligned batch tile, and the remainder batch-pad path.
    B2 = 19
    x2, weights2, biases2 = make_case(k2, B2, T, D, Co)
    ref2 = cnn_encoding_reference(x2, weights2, biases2, Ks)
    w2, b2, m2, cos2 = pack_cnn_encoding_params(weights2, biases2, Ks,
                                                compute_dtype=jnp.float32)
    out2 = jax.block_until_ready(cnn_encoding_pallas(x2, w2, b2, m2, Ks, cos2))
    assert out2.shape == (B2, Co * len(Ks)), out2.shape
    assert jnp.allclose(out2, ref2, atol=1e-4, rtol=1e-4), \
        float(jnp.max(jnp.abs(out2 - ref2)))

    print("KERNEL_OK")
</pallas_src>

<mosaic_0001>
module attributes {stable_mosaic.version = 11 : i64} {
  func.func @_cnn_fused_kernel(%arg0: i32, %arg1: memref<2x8x32xf32, #tpu.memory_space<vmem>>, %arg2: memref<5x32x128xf32, #tpu.memory_space<vmem>>, %arg3: memref<1x128xf32, #tpu.memory_space<vmem>>, %arg4: memref<1x128xf32, #tpu.memory_space<vmem>>, %arg5: memref<2x128xf32, #tpu.memory_space<vmem>>) attributes {dimension_semantics = [#tpu.dimension_semantics<parallel>], iteration_bounds = array<i64: 1>, scalar_prefetch = 0 : i64, scratch_operands = 0 : i64, tpu.core_type = #tpu.core_type<tc>, window_params = [{transform_indices = @transform_0, window_bounds = array<i64: 2, 8, 32>}, {pipeline_mode = #tpu.pipeline_mode<synchronous>, transform_indices = @transform_1, window_bounds = array<i64: 5, 32, 128>}, {pipeline_mode = #tpu.pipeline_mode<synchronous>, transform_indices = @transform_2, window_bounds = array<i64: 1, 128>}, {pipeline_mode = #tpu.pipeline_mode<synchronous>, transform_indices = @transform_3, window_bounds = array<i64: 1, 128>}, {transform_indices = @transform_4, window_bounds = array<i64: 2, 128>}]} {
    %c0 = arith.constant 0 : index
    %c0_0 = arith.constant 0 : index
    %c0_1 = arith.constant 0 : index
    %0 = vector.load %arg1[%c0, %c0_0, %c0_1] : memref<2x8x32xf32, #tpu.memory_space<vmem>>, vector<2x8x32xf32>
    %cst = arith.constant 0.000000e+00 : f32
    %1 = vector.broadcast %cst : f32 to vector<2x2x32xf32>
    %cst_2 = arith.constant 0.000000e+00 : f32
    %2 = vector.broadcast %cst_2 : f32 to vector<2x2x32xf32>
    %3 = tpu.concatenate %1, %0, %2 in 1 : vector<2x2x32xf32>, vector<2x8x32xf32>, vector<2x2x32xf32> -> vector<2x12x32xf32>
    %4 = vector.extract_strided_slice %3 {offsets = [0, 0, 0], sizes = [2, 8, 32], strides = [1, 1, 1]} : vector<2x12x32xf32> to vector<2x8x32xf32>
    %5 = vector.shape_cast %4 : vector<2x8x32xf32> to vector<16x32xf32>
    %c0_3 = arith.constant 0 : index
    %c0_4 = arith.constant 0 : index
    %c0_5 = arith.constant 0 : index
    %6 = vector.load %arg2[%c0_3, %c0_4, %c0_5] : memref<5x32x128xf32, #tpu.memory_space<vmem>>, vector<1x32x128xf32>
    %7 = vector.shape_cast %6 : vector<1x32x128xf32> to vector<32x128xf32>
    %cst_6 = arith.constant dense<0.000000e+00> : vector<16x128xf32>
    %8 = tpu.matmul %5, %7, %cst_6 {dimension_numbers = #tpu.dot_dimension_numbers<[1], [0], [0], [1], [0, 0, 1, 1], [], []>} : vector<16x32xf32>, vector<32x128xf32>, vector<16x128xf32> -> vector<16x128xf32>
    %9 = vector.extract_strided_slice %3 {offsets = [0, 1, 0], sizes = [2, 8, 32], strides = [1, 1, 1]} : vector<2x12x32xf32> to vector<2x8x32xf32>
    %10 = vector.shape_cast %9 : vector<2x8x32xf32> to vector<16x32xf32>
    %c1 = arith.constant 1 : index
    %c0_7 = arith.constant 0 : index
    %c0_8 = arith.constant 0 : index
    %11 = vector.load %arg2[%c1, %c0_7, %c0_8] : memref<5x32x128xf32, #tpu.memory_space<vmem>>, vector<1x32x128xf32>
    %12 = vector.shape_cast %11 : vector<1x32x128xf32> to vector<32x128xf32>
    %cst_9 = arith.constant dense<0.000000e+00> : vector<16x128xf32>
    %13 = tpu.matmul %10, %12, %cst_9 {dimension_numbers = #tpu.dot_dimension_numbers<[1], [0], [0], [1], [0, 0, 1, 1], [], []>} : vector<16x32xf32>, vector<32x128xf32>, vector<16x128xf32> -> vector<16x128xf32>
    %14 = arith.addf %8, %13 : vector<16x128xf32>
    %15 = vector.extract_strided_slice %3 {offsets = [0, 2, 0], sizes = [2, 8, 32], strides = [1, 1, 1]} : vector<2x12x32xf32> to vector<2x8x32xf32>
    %16 = vector.shape_cast %15 : vector<2x8x32xf32> to vector<16x32xf32>
    %c2 = arith.constant 2 : index
    %c0_10 = arith.constant 0 : index
    %c0_11 = arith.constant 0 : index
    %17 = vector.load %arg2[%c2, %c0_10, %c0_11] : memref<5x32x128xf32, #tpu.memory_space<vmem>>, vector<1x32x128xf32>
    %18 = vector.shape_cast %17 : vector<1x32x128xf32> to vector<32x128xf32>
    %cst_12 = arith.constant dense<0.000000e+00> : vector<16x128xf32>
    %19 = tpu.matmul %16, %18, %cst_12 {dimension_numbers = #tpu.dot_dimension_numbers<[1], [0], [0], [1], [0, 0, 1, 1], [], []>} : vector<16x32xf32>, vector<32x128xf32>, vector<16x128xf32> -> vector<16x128xf32>
    %20 = arith.addf %14, %19 : vector<16x128xf32>
    %21 = vector.extract_strided_slice %3 {offsets = [0, 3, 0], sizes = [2, 8, 32], strides = [1, 1, 1]} : vector<2x12x32xf32> to vector<2x8x32xf32>
    %22 = vector.shape_cast %21 : vector<2x8x32xf32> to vector<16x32xf32>
    %c3 = arith.constant 3 : index
    %c0_13 = arith.constant 0 : index
    %c0_14 = arith.constant 0 : index
    %23 = vector.load %arg2[%c3, %c0_13, %c0_14] : memref<5x32x128xf32, #tpu.memory_space<vmem>>, vector<1x32x128xf32>
    %24 = vector.shape_cast %23 : vector<1x32x128xf32> to vector<32x128xf32>
    %cst_15 = arith.constant dense<0.000000e+00> : vector<16x128xf32>
    %25 = tpu.matmul %22, %24, %cst_15 {dimension_numbers = #tpu.dot_dimension_numbers<[1], [0], [0], [1], [0, 0, 1, 1], [], []>} : vector<16x32xf32>, vector<32x128xf32>, vector<16x128xf32> -> vector<16x128xf32>
    %26 = arith.addf %20, %25 : vector<16x128xf32>
    %27 = vector.extract_strided_slice %3 {offsets = [0, 4, 0], sizes = [2, 8, 32], strides = [1, 1, 1]} : vector<2x12x32xf32> to vector<2x8x32xf32>
    %28 = vector.shape_cast %27 : vector<2x8x32xf32> to vector<16x32xf32>
    %c4 = arith.constant 4 : index
    %c0_16 = arith.constant 0 : index
    %c0_17 = arith.constant 0 : index
    %29 = vector.load %arg2[%c4, %c0_16, %c0_17] : memref<5x32x128xf32, #tpu.memory_space<vmem>>, vector<1x32x128xf32>
    %30 = vector.shape_cast %29 : vector<1x32x128xf32> to vector<32x128xf32>
    %cst_18 = arith.constant dense<0.000000e+00> : vector<16x128xf32>
    %31 = tpu.matmul %28, %30, %cst_18 {dimension_numbers = #tpu.dot_dimension_numbers<[1], [0], [0], [1], [0, 0, 1, 1], [], []>} : vector<16x32xf32>, vector<32x128xf32>, vector<16x128xf32> -> vector<16x128xf32>
    %32 = arith.addf %26, %31 : vector<16x128xf32>
    %33 = vector.shape_cast %32 : vector<16x128xf32> to vector<2x8x128xf32>
    %34 = vector.extract_strided_slice %33 {offsets = [0, 0, 0], sizes = [2, 7, 128], strides = [1, 1, 1]} : vector<2x8x128xf32> to vector<2x7x128xf32>
    %cst_19 = arith.constant dense<0xFF800000> : vector<2x128xf32>
    %35 = vector.multi_reduction <maximumf>, %34, %cst_19 [1] : vector<2x7x128xf32> to vector<2x128xf32>
    %36 = vector.extract_strided_slice %33 {offsets = [0, 7, 0], sizes = [2, 1, 128], strides = [1, 1, 1]} : vector<2x8x128xf32> to vector<2x1x128xf32>
    %37 = vector.shape_cast %36 : vector<2x1x128xf32> to vector<2x128xf32>
    %c0_20 = arith.constant 0 : index
    %c0_21 = arith.constant 0 : index
    %38 = vector.load %arg3[%c0_20, %c0_21] : memref<1x128xf32, #tpu.memory_space<vmem>>, vector<1x128xf32>
    %39 = vector.broadcast %38 : vector<1x128xf32> to vector<2x128xf32>
    %40 = arith.addf %37, %39 : vector<2x128xf32>
    %41 = arith.maximumf %35, %40 : vector<2x128xf32>
    %c0_22 = arith.constant 0 : index
    %c0_23 = arith.constant 0 : index
    %42 = vector.load %arg4[%c0_22, %c0_23] : memref<1x128xf32, #tpu.memory_space<vmem>>, vector<1x128xf32>
    %43 = vector.broadcast %42 : vector<1x128xf32> to vector<2x128xf32>
    %44 = arith.addf %41, %43 : vector<2x128xf32>
    %c0_24 = arith.constant 0 : index
    %c0_25 = arith.constant 0 : index
    %45 = vector.load %arg5[%c0_24, %c0_25] : memref<2x128xf32, #tpu.memory_space<vmem>>, vector<2x128xf32>
    tpu.vector_store %arg5[%c0_24, %c0_25], %44 {strides = array<i32>} : memref<2x128xf32, #tpu.memory_space<vmem>>, vector<2x128xf32>,
    return
  }
  func.func @transform_0(%arg0: i32) -> (i32, i32, i32) {
    %c0_i32 = arith.constant 0 : i32
    %c0_i32_0 = arith.constant 0 : i32
    %c0_i32_1 = arith.constant 0 : i32
    return %arg0, %c0_i32, %c0_i32_0 : i32, i32, i32
  }
  func.func @transform_1(%arg0: i32) -> (i32, i32, i32) {
    %c0_i32 = arith.constant 0 : i32
    %c0_i32_0 = arith.constant 0 : i32
    %c0_i32_1 = arith.constant 0 : i32
    %c0_i32_2 = arith.constant 0 : i32
    return %c0_i32, %c0_i32_0, %c0_i32_1 : i32, i32, i32
  }
  func.func @transform_2(%arg0: i32) -> (i32, i32) {
    %c0_i32 = arith.constant 0 : i32
    %c0_i32_0 = arith.constant 0 : i32
    %c0_i32_1 = arith.constant 0 : i32
    return %c0_i32, %c0_i32_0 : i32, i32
  }
  func.func @transform_3(%arg0: i32) -> (i32, i32) {
    %c0_i32 = arith.constant 0 : i32
    %c0_i32_0 = arith.constant 0 : i32
    %c0_i32_1 = arith.constant 0 : i32
    return %c0_i32, %c0_i32_0 : i32, i32
  }
  func.func @transform_4(%arg0: i32) -> (i32, i32) {
    %c0_i32 = arith.constant 0 : i32
    %c0_i32_0 = arith.constant 0 : i32
    return %arg0, %c0_i32 : i32, i32
  }
}

</mosaic_0001>

<bundles_post_ra>
// kernel: tpu_custom_call.1
= control target key start
LH: loop header
LB: loop body
LE: loop exit
PB: predicated region body
PF: predicated region fallthrough
CT: control target
= control target key end

     0   :  { %9 = vsyncpa [#allocation3], 0  ;;  %s890_s0 = inlined_call_operand.hbm [shape: f32[2,8,32], index: 0, kind: input, shape index: {}]   ;;  %s891_s1 = inlined_call_operand.hbm [shape: f32[5,32,128], index: 1, kind: input, shape index: {}]   ;;  %s892_s2 = inlined_call_operand.vmem [shape: f32[1,128], index: 2, kind: input, shape index: {}]   ;;  %s893_s3 = inlined_call_operand.vmem [shape: f32[1,128], index: 3, kind: input, shape index: {}]   ;;  %s894_s4 = inlined_call_operand.hbm [shape: f32[2,128], index: 4, kind: output, shape index: {}]  }
   0x1   :  { %10 = vsyncpa [#allocation6], 0 }
   0x2   :  { %11 = vsyncpa [#allocation4], 0  ;;  %s796_s15 = smov [#allocation2]   ;;  %s724_s19 = scalar_lea.hbm %s890_s0, 256 }
   0x3   :  { %s17_s16 = sshll.u32 %s796_s15, 4  ;;  %p725_p0 = scmp.ne.s32.totalorder %s890_s0, %s724_s19  ;;  %s18_s16 = int_to_ptr.vmem [resolvable:$true] %s17_s16 }
   0x4   :  { %p728_p1 = scmp.lt.u32.totalorder %s724_s19, %s890_s0 }
   0x6   :  { %p730_p2 = pnand %p728_p1, %p725_p0 }
   0x8   :  { %733 = shalt.err (!%p730_p2)
}
   0x9   :  { %s734_s24 = scalar_lea.vmem %s18_s16, 256  ;;  %p739_p4 = scmp.lt.s32.totalorder %s18_s16, %s18_s16 }
   0xa   :  { %p735_p3 = scmp.ne.s32.totalorder %s18_s16, %s734_s24  ;;  %p740_p5 = scmp.lt.s32.totalorder %s734_s24, %s734_s24 }
   0xc   :  { %p741_p6 = por %p740_p5, %p739_p4 }
   0xe   :  { %p742_p7 = pnand %p741_p6, %p735_p3 }
  0x10   :  { %745 = shalt.err (!%p742_p7)
}
  0x11   :  { %s797_s25 = smov 128   ;;  %s798_s26 = smov 8  }
  0x12   :  { %23 = dma.hbm_to_vmem [thread:$0]  %s890_s0, 256, %s18_s16, [#allocation3], %s797_s25, %s797_s25, %s798_s26  }
  0x13   :  { %s799_s29 = smov [#allocation5]   ;;  %s746_s7 = scalar_lea.hbm %s891_s1, 2560 }
  0x14   :  { %s29_s30 = sshll.u32 %s799_s29, 4  ;;  %p747_p8 = scmp.ne.s32.totalorder %s891_s1, %s746_s7  ;;  %s30_s30 = int_to_ptr.vmem [resolvable:$true] %s29_s30 }
  0x15   :  { %p750_p9 = scmp.lt.u32.totalorder %s746_s7, %s891_s1 }
  0x17   :  { %p752_p10 = pnand %p750_p9, %p747_p8 }
  0x19   :  { %755 = shalt.err (!%p752_p10)
}
  0x1a   :  { %s756_s12 = scalar_lea.vmem %s30_s30, 2560  ;;  %p761_p12 = scmp.lt.s32.totalorder %s30_s30, %s30_s30 }
  0x1b   :  { %p757_p11 = scmp.ne.s32.totalorder %s30_s30, %s756_s12  ;;  %p762_p13 = scmp.lt.s32.totalorder %s756_s12, %s756_s12 }
  0x1d   :  { %p763_p0 = por %p762_p13, %p761_p12 }
  0x1f   :  { %p764_p1 = pnand %p763_p0, %p757_p11 }
  0x21   :  { %767 = shalt.err (!%p764_p1)
}
  0x22   :  { %35 = dma.hbm_to_vmem [thread:$0]  %s891_s1, 2560, %s30_s30, [#allocation6], %s797_s25, %s797_s25, %s798_s26  }
  0x23   :  { %790 = dma.done.wait [#allocation3], 256  }
  0x24   :  { %791 = vsyncadd [#allocation3], 4294967040 }
  0x25   :  { %792 = dma.done.wait [#allocation6], 2560  }
  0x26   :  { %793 = vsyncadd [#allocation6], 4294964736  ;;  %v75_v0 = vld [vmem:[#allocation5 + $0x20] sm:$0xff]  ;;  %v76_v1 = vld [vmem:[#allocation5 + $0x28] sm:$0xff]  ;;  %vm54_vm0 = vcmask 1041408   ;;  %vm67_vm1 = vcmask 1046528  }
  0x27   :  { %v246_v2 = vld [vmem:[#allocation5 + $0x40] sm:$0xff]  ;;  %v671_v3 = vpack.c.bf16 %v76_v1, %v75_v0  ;;  %v247_v4 = vld [vmem:[#allocation5 + $0x48] sm:$0xff]  ;;  %v77_v5 = vld [vmem:[#allocation5 + $0x30] sm:$0xff]  ;;  %vm79_vm2 = vcmask 261120   ;;  %vm238_vm3 = vcmask 1045504   ;;  %vm331_vm4 = vcmask 1044480  }
  0x28   :  { %v78_v6 = vld [vmem:[#allocation5 + $0x38] sm:$0xff]  ;;  %v687_v7 = vpack.c.bf16 %v247_v4, %v246_v2  ;;  %v248_v9 = vld [vmem:[#allocation5 + $0x50] sm:$0xff]  ;;  %v59_v15 = vld [vmem:[#allocation5] sm:$0xff]  ;;  %vm424_vm5 = vcmask 1043456   ;;  %s800_s17 = smov [#allocation7]  }
  0x29   :  { %v675_v8 = vpack.c.bf16 %v78_v6, %v77_v5  ;;  %v249_v10 = vld [vmem:[#allocation5 + $0x58] sm:$0xff]  ;;  %v46_v11 = vld [vmem:[#allocation2] sm:$0xff]  ;;  %672 = vmatprep.subr.bf16.mxu1 %v671_v3  ;;  %v60_v16 = vld [vmem:[#allocation5 + $0x8] sm:$0xff]  ;;  %s564_s18 = sshll.u32 %s800_s17, 4  ;;  %s565_s18 = int_to_ptr.vmem [resolvable:$true] %s564_s18 }
  0x2a   :  { %v691_v12 = vpack.c.bf16 %v249_v10, %v248_v9  ;;  %v50_v13 = vrot.slane %v46_v11, 6  ;;  %v47_v14 = vld [vmem:[#allocation2 + $0x8] sm:$0xff]  ;;  %688 = vmatprep.subr.bf16.mxu0 %v687_v7  ;;  %674 = vmatpush3.bf16.msra.mxu1 %v671_v3  ;;  %v339_v18 = vld [vmem:[#allocation5 + $0x60] sm:$0xff]  ;;  %v340_v19 = vld [vmem:[#allocation5 + $0x68] sm:$0xff]  ;;  %v679_v23 = vpack.c.bf16 %v60_v16, %v59_v15  ;;  %p773_p3 = scmp.lt.s32.totalorder %s565_s18, %s565_s18 }
  0x2b   :  { %v51_v17 = vrot.slane %v47_v14, 6  ;;  %v61_v20 = vld [vmem:[#allocation5 + $0x10] sm:$0xff]  ;;  %690 = vmatpush3.bf16.msra.mxu0 %v687_v7  ;;  %676 = vmatprep.subr.bf16.mxu1 %v675_v8  ;;  %v62_v24 = vld [vmem:[#allocation5 + $0x18] sm:$0xff]  ;;  %v695_v31 = vpack.c.bf16 %v340_v19, %v339_v18  ;;  %v432_v46 = vld [vmem:[#allocation5 + $0x80] sm:$0xff] }
  0x2c   :  { %v55_v21 = vsel %vm54_vm0, 0.0, %v50_v13  ;;  %v57_v22 = vsel %vm54_vm0, %v50_v13, 0.0  ;;  %692 = vmatprep.subr.bf16.mxu0 %v691_v12  ;;  %v683_v32 = vpack.c.bf16 %v62_v24, %v61_v20  ;;  %v341_v33 = vld [vmem:[#allocation5 + $0x70] sm:$0xff]  ;;  %v342_v34 = vld [vmem:[#allocation5 + $0x78] sm:$0xff]  ;;  %v433_v47 = vld [vmem:[#allocation5 + $0x88] sm:$0xff] }
  0x2d   :  { %v68_v25 = vrot.slane %v55_v21, 1  ;;  %v69_v26 = vrot.slane %v57_v22, 1  ;;  %v239_v27 = vrot.slane %v55_v21, 2  ;;  %v240_v28 = vrot.slane %v57_v22, 2  ;;  %v434_v54 = vld [vmem:[#allocation5 + $0x90] sm:$0xff]  ;;  %v435_v55 = vld [vmem:[#allocation5 + $0x98] sm:$0xff] }
  0x2e   :  { %v56_v29 = vsel %vm54_vm0, 0.0, %v51_v17  ;;  %v58_v30 = vsel %vm54_vm0, %v51_v17, 0.0  ;;  %678 = vmatpush3.bf16.msra.mxu1 %v675_v8  ;;  %v332_v41 = vrot.slane %v55_v21, 3  ;;  %v333_v42 = vrot.slane %v57_v22, 3  ;;  %v584_v13 = vld [vmem:[%s892_s2] ss:$0 sm:$0xff] }
  0x2f   :  { %v70_v35 = vsel %vm67_vm1, %v68_v25, %v69_v26  ;;  %v241_v36 = vsel %vm238_vm3, %v239_v27, %v240_v28  ;;  %v71_v37 = vrot.slane %v56_v29, 1  ;;  %v72_v38 = vrot.slane %v58_v30, 1  ;;  %694 = vmatpush3.bf16.msra.mxu0 %v691_v12  ;;  %680 = vmatprep.subr.bf16.mxu1 %v679_v23  ;;  %s768_s2 = scalar_lea.vmem %s565_s18, 32 }
  0x30   :  { %624 = vmatprep.mubr.msk.f32.mxu1 %vm79_vm2, %v70_v35  ;;  %v242_v39 = vrot.slane %v56_v29, 2  ;;  %v243_v40 = vrot.slane %v58_v30, 2  ;;  %646 = vmatprep.mubr.msk.f32.mxu0 %vm79_vm2, %v241_v36  ;;  %v699_v44 = vpack.c.bf16 %v342_v34, %v341_v33  ;;  %v334_v48 = vsel %vm331_vm4, %v332_v41, %v333_v42  ;;  %p769_p2 = scmp.ne.s32.totalorder %s565_s18, %s768_s2  ;;  %p774_p4 = scmp.lt.s32.totalorder %s768_s2, %s768_s2 }
  0x31   :  { %v73_v43 = vsel %vm67_vm1, %v71_v37, %v72_v38  ;;  %696 = vmatprep.subr.bf16.mxu0 %v695_v31  ;;  %v335_v49 = vrot.slane %v56_v29, 3  ;;  %v336_v50 = vrot.slane %v58_v30, 3  ;;  %v703_v51 = vpack.c.bf16 %v433_v47, %v432_v46 }
  0x32   :  { %625 = vmatmul.mubr.msk.f32.vlgmr.msra.gmra.mrb[0].mxu1 %vm79_vm2, %v73_v43  ;;  %v244_v45 = vsel %vm238_vm3, %v242_v39, %v243_v40  ;;  %v425_v52 = vrot.slane %v55_v21, 4  ;;  %v426_v53 = vrot.slane %v57_v22, 4  ;;  %v707_v57 = vpack.c.bf16 %v435_v55, %v434_v54  ;;  %p775_p5 = por %p774_p4, %p773_p3 }
  0x33   :  { %647 = vmatmul.mubr.msk.f32.vlgmr.msra.gmra.mrb[0].mxu0 %vm79_vm2, %v244_v45  ;;  %682 = vmatpush3.bf16.msra.mxu1 %v679_v23  ;;  %v337_v56 = vsel %vm331_vm4, %v335_v49, %v336_v50  ;;  %v428_v59 = vrot.slane %v56_v29, 4  ;;  %v429_v60 = vrot.slane %v58_v30, 4 }
  0x34   :  { %698 = vmatpush3.bf16.msra.mxu0 %v695_v31  ;;  %684 = vmatprep.subr.bf16.mxu1 %v683_v32  ;;  %v427_v58 = vsel %vm424_vm5, %v425_v52, %v426_v53  ;;  %p776_p6 = pnand %p775_p5, %p769_p2 }
  0x35   :  { %700 = vmatprep.subr.bf16.mxu0 %v699_v44  ;;  %635 = vmatprep.mubr.msk.f32.mxu1 %vm79_vm2, %v55_v21  ;;  %v430_v61 = vsel %vm424_vm5, %v428_v59, %v429_v60  ;;  %v585_v21 = vld [vmem:[%s893_s3] ss:$0 sm:$0xff] }
  0x36   :  { %657 = vmatprep.mubr.msk.f32.mxu0 %vm79_vm2, %v334_v48 }
  0x37   :  { %686 = vmatpush3.bf16.msra.mxu1 %v683_v32 }
  0x38   :  { %702 = vmatpush3.bf16.msra.mxu0 %v699_v44 }
  0x39   :  { %704 = vmatprep.subr.bf16.mxu0 %v703_v51 }
  0x3a   :  { %636 = vmatmul.mubr.msk.f32.vlgmr.msra.gmra.mrb[0].mxu1 %vm79_vm2, %v56_v29 }
  0x3b   :  { %658 = vmatmul.mubr.msk.f32.vlgmr.msra.gmra.mrb[0].mxu0 %vm79_vm2, %v337_v56 }
  0x3c   :  { %706 = vmatpush3.bf16.msra.mxu0 %v703_v51  ;;  %668 = vmatprep.mubr.msk.f32.mxu0 %vm79_vm2, %v427_v58 }
  0x3d   :  { %708 = vmatprep.subr.bf16.mxu0 %v707_v57 }
  0x40   :  { %710 = vmatpush3.bf16.msra.mxu0 %v707_v57 }
  0x43   :  { %669 = vmatmul.mubr.msk.f32.vlgmr.msra.gmra.mrb[0].mxu0 %vm79_vm2, %v430_v61 }
 0x10d   :  { %v637_v62 = vpop.f32.mrb[0].mxu1 }
 0x10e   :  { %v229_v63 = vpop.f32.mrb[1].mxu1 }
 0x116   :  { %v670_v0 = vpop.f32.mrb[0].mxu0 }
 0x117   :  { %v711_v1 = vadd.f32 %v670_v0, %v637_v62  ;;  %v506_v2 = vpop.f32.mrb[1].mxu0 }
 0x118   :  { %v712_v3 = vadd.f32 %v506_v2, %v229_v63 }
 0x119   :  { %v524_v4 = vsel %vm67_vm1, %v711_v1, -inf  ;;  %v539_v18 = vadd.f32 %v711_v1, %v584_v13 }
 0x11a   :  { %v525_v5 = vrot.slane %v524_v4, 4  ;;  %v517_v6 = vsel %vm67_vm1, %v712_v3, -inf  ;;  %v538_v20 = vadd.f32 %v712_v3, %v584_v13 }
 0x11b   :  { %v518_v7 = vrot.slane %v517_v6, 4 }
 0x11c   :  { %v526_v8 = vmax.f32 %v524_v4, %v525_v5 }
 0x11d   :  { %v519_v9 = vmax.f32 %v517_v6, %v518_v7 }
 0x11e   :  { %v527_v10 = vrot.slane %v526_v8, 2 }
 0x11f   :  { %v520_v11 = vrot.slane %v519_v9, 2 }
 0x120   :  { %v528_v12 = vmax.f32 %v526_v8, %v527_v10 }
 0x121   :  { %v521_v14 = vmax.f32 %v519_v9, %v520_v11 }
 0x122   :  { %v529_v15 = vrot.slane %v528_v12, 1 }
 0x123   :  { %v522_v16 = vrot.slane %v521_v14, 1 }
 0x124   :  { %v530_v17 = vmax.f32 %v528_v12, %v529_v15 }
 0x125   :  { %v523_v19 = vmax.f32 %v521_v14, %v522_v16 }
 0x126   :  { %v541_v22 = vmax.f32 %v530_v17, %v539_v18 }
 0x127   :  { %v540_v23 = vmax.f32 %v523_v19, %v538_v20 }
 0x128   :  { %v550_v24 = vadd.f32 %v585_v21, %v541_v22 }
 0x129   :  { %v549_v25 = vadd.f32 %v585_v21, %v540_v23 }
 0x12a   :  { %v553_v26 = vrot.slane %v550_v24, 7 }
 0x12b   :  { %556 = vst [vmem:[#allocation7 - $0x7] sm:$0x80] %v549_v25 }
 0x12c   :  { %557 = vst [vmem:[#allocation7 + $0x1] sm:$0x1] %v553_v26 }
 0x12d   :  { %779 = shalt.err (!%p776_p6)
}
 0x12e   :  { %s780_s3 = scalar_lea.hbm %s894_s4, 32 }
 0x12f   :  { %p781_p7 = scmp.ne.s32.totalorder %s894_s4, %s780_s3  ;;  %p784_p8 = scmp.lt.u32.totalorder %s780_s3, %s894_s4 }
 0x131   :  { %p786_p9 = pnand %p784_p8, %p781_p7 }
 0x133   :  { %789 = shalt.err (!%p786_p9)
}
 0x134   :  { %567 = dma.vmem_to_hbm [thread:$0]  %s565_s18, 32, %s894_s4, [#allocation4]  }
 0x135   :  { %794 = dma.done.wait [#allocation4], 32  }
 0x136   :  { %795 = vsyncadd [#allocation4], 4294967264 }
 0x137   :  { %571 = vsyncpa [#allocation3], 1 }
 0x138   :  { %572 = vsyncpa [#allocation6], 1 }
 0x139   :  { %573 = vsyncpa [#allocation4], 1 }

</bundles_post_ra>
